<compile_context>
chip_gen: v6e
topology: v6e:2x2x1
jax: 0.10.0
libtpu: 0.0.40
codegen_flags: <defaults>
</compile_context>

<pallas_src>
import functools

import jax
import jax.numpy as jnp
from jax.experimental import pallas as pl
from jax.experimental.pallas import tpu as pltpu


def _make_divisible(v, divisor, min_value=None):
    if min_value is None:
        min_value = divisor
    new_v = max(min_value, int(v + divisor / 2) // divisor * divisor)
    if new_v < 0.9 * v:
        new_v += divisor
    return new_v


# ---------------------------------------------------------------------------
# Kernels
# ---------------------------------------------------------------------------
def _se_kernel_chw(x_ref, w1_ref, b1_ref, w2_ref, b2_ref, o_ref, *, inv_hw):
    """x_ref: (TB, C, HWp) block; spatial on lanes. Weights pre-transposed."""
    # AdaptiveAvgPool2d(1): lane reduce with f32 accumulation (no full-tile
    # f32 temporary for bf16 inputs).  Padded lanes are zero, so dividing by
    # the true HW keeps the mean exact.
    pooled = jnp.sum(x_ref[...], axis=2, dtype=jnp.float32) * inv_hw      # (TB, C)

    # conv_reduce: 1x1 conv == matmul C->R + bias, then ReLU.  Native-dtype
    # weights on the MXU, f32 accumulation.
    s = jnp.dot(pooled.astype(w1_ref.dtype), w1_ref[...],
                preferred_element_type=jnp.float32)
    s = jnp.maximum(s + b1_ref[...].astype(jnp.float32), 0.0)             # (TB, R)

    # conv_expand: 1x1 conv == matmul R->C + bias.
    e = jnp.dot(s.astype(w2_ref.dtype), w2_ref[...],
                preferred_element_type=jnp.float32)
    e = e + b2_ref[...].astype(jnp.float32)                               # (TB, C)

    # gate_fn: hard_sigmoid(x) = relu6(x + 3) / 6, computed in f32, cast once.
    gate = (jnp.clip(e + 3.0, 0.0, 6.0) * (1.0 / 6.0)).astype(x_ref.dtype)

    # x * gate, broadcast over the spatial lane dim, in the input dtype.
    o_ref[...] = x_ref[...] * gate[:, :, None]


def _se_kernel_hwc(x_ref, w1_ref, b1_ref, w2_ref, b2_ref, o_ref, *, inv_hw):
    """x_ref: (TB, HW, C) block; channels on lanes (used when C % 128 == 0)."""
    pooled = jnp.sum(x_ref[...], axis=1, dtype=jnp.float32) * inv_hw      # (TB, C)
    s = jnp.dot(pooled.astype(w1_ref.dtype), w1_ref[...],
                preferred_element_type=jnp.float32)
    s = jnp.maximum(s + b1_ref[...].astype(jnp.float32), 0.0)             # (TB, R)
    e = jnp.dot(s.astype(w2_ref.dtype), w2_ref[...],
                preferred_element_type=jnp.float32)
    e = e + b2_ref[...].astype(jnp.float32)                               # (TB, C)
    gate = (jnp.clip(e + 3.0, 0.0, 6.0) * (1.0 / 6.0)).astype(x_ref.dtype)
    # Lane-dense (1, C) row broadcast over HW sublanes.
    o_ref[...] = x_ref[...] * gate[:, None, :]


# ---------------------------------------------------------------------------
# Generation-aware tuning helpers
# ---------------------------------------------------------------------------
def _tpu_vmem_and_cores():
    """Physical VMEM per TensorCore and TC count (inferred; safe fallback)."""
    vmem_bytes = 64 * 1024 * 1024   # conservative default (v7x-sized VMEM)
    num_tc = 2
    try:
        info = pltpu.get_tpu_info()
        vmem_bytes = int(getattr(info, "vmem_capacity_bytes", vmem_bytes))
        # 64 MiB/TC => v7x-class (2 TCs/chip); 128 MiB => v5e/v6e (1 TC/chip).
        num_tc = 2 if vmem_bytes <= 64 * 1024 * 1024 else 1
    except Exception:
        pass
    return vmem_bytes, num_tc


def _pick_block_batch(N, per_batch_bytes, weight_bytes, C, sub, budget, num_tc):
    """Largest divisor of N fitting the VMEM budget, preferring an even number
    of grid steps on 2-TC chips and a TB that fills a full sublane tile."""
    best_key, best_tb = None, 1   # tb=1 fallback even if over budget (vmem_limit is generous)
    for tb in range(1, N + 1):
        if N % tb:
            continue
        steps = N // tb
        if num_tc >= 2 and N >= 2 and steps < 2:
            continue  # keep both TensorCores busy on v7x
        # in + out blocks (double-buffered) + resident weight buffers + small f32 temps.
        need = 4 * tb * per_batch_bytes + weight_bytes + 16 * tb * C
        if need > budget:
            continue
        even_ok = 1 if (num_tc < 2 or steps % 2 == 0) else 0
        sub_ok = 1 if (tb % sub == 0 or tb == N) else 0
        key = (even_ok, sub_ok, tb)
        if best_key is None or key > best_key:
            best_key, best_tb = key, tb
    return best_tb


# ---------------------------------------------------------------------------
# Wrapper
# ---------------------------------------------------------------------------
def squeeze_excite(x, w1, b1, w2, b2):
    """SqueezeExcite forward. x: (N,C,H,W); w1: (R,C); b1: (R,); w2: (C,R); b2: (C,)."""
    N, C, H, W = x.shape
    R = w1.shape[0]
    HW = H * W

    vmem_phys, num_tc = _tpu_vmem_and_cores()
    if vmem_phys >= 100 * 1024 * 1024:                 # v5e / v6e: 128 MiB physical
        picker_budget, vmem_limit = 48 * 1024 * 1024, 96 * 1024 * 1024
    else:                                              # v7x: 64 MiB physical
        picker_budget, vmem_limit = 22 * 1024 * 1024, 48 * 1024 * 1024

    # One-time (XLA-side) weight transposes and 2-D biases: no per-step XLU work.
    w1t = jnp.transpose(w1)          # (C, R)
    w2t = jnp.transpose(w2)          # (R, C)
    b1_2d = b1.reshape(1, R)
    b2_2d = b2.reshape(1, C)

    # Lane-dense layout selection (see header comment).
    channels_last = (HW % 128 != 0) and (C % 128 == 0)
    if channels_last:
        x3 = x.transpose(0, 2, 3, 1).reshape(N, HW, C)
        lane_elems = HW * C
        kernel = functools.partial(_se_kernel_hwc, inv_hw=float(1.0 / HW))
        block_of = lambda tb: (tb, HW, C)
    else:
        hw_pad = HW if HW % 128 == 0 else ((HW + 127) // 128) * 128
        x3 = x.reshape(N, C, HW)
        if hw_pad != HW:
            x3 = jnp.pad(x3, ((0, 0), (0, 0), (0, hw_pad - HW)))
        lane_elems = C * hw_pad
        kernel = functools.partial(_se_kernel_chw, inv_hw=float(1.0 / HW))
        block_of = lambda tb: (tb, C, hw_pad)

    # Block-batch selection (generation aware).
    x_bytes = x.dtype.itemsize
    weight_bytes = 2 * ((C * R + R * C) * w1.dtype.itemsize
                        + (R + C) * b1.dtype.itemsize)      # double-buffered weights
    sub = 16 if x.dtype == jnp.bfloat16 else 8               # sublane-fill preference
    per_batch_bytes = lane_elems * x_bytes
    TB = _pick_block_batch(N, per_batch_bytes, weight_bytes, C, sub,
                           picker_budget, num_tc)
    grid = (N // TB,)

    x_spec = pl.BlockSpec(block_of(TB), lambda n: (n, 0, 0))

    out3 = pl.pallas_call(
        kernel,
        out_shape=jax.ShapeDtypeStruct(x3.shape, x.dtype),
        grid_spec=pltpu.PrefetchScalarGridSpec(
            num_scalar_prefetch=0,
            grid=grid,
            in_specs=[
                x_spec,
                pl.BlockSpec((C, R), lambda n: (0, 0)),
                pl.BlockSpec((1, R), lambda n: (0, 0)),
                pl.BlockSpec((R, C), lambda n: (0, 0)),
                pl.BlockSpec((1, C), lambda n: (0, 0)),
            ],
            out_specs=x_spec,
        ),
        compiler_params=pltpu.CompilerParams(
            dimension_semantics=("parallel",),
            vmem_limit_bytes=int(vmem_limit),
        ),
    )(x3, w1t, b1_2d, w2t, b2_2d)

    if channels_last:
        return out3.reshape(N, H, W, C).transpose(0, 3, 1, 2)
    if out3.shape[-1] != HW:
        out3 = out3[:, :, :HW]
    return out3.reshape(N, C, H, W)


def _reference(x, w1, b1, w2, b2):
    pooled = jnp.mean(x, axis=(2, 3))                        # (N, C)
    s = jnp.maximum(pooled @ w1.T + b1, 0.0)                 # (N, R)
    e = s @ w2.T + b2                                        # (N, C)
    gate = jnp.clip(e + 3.0, 0.0, 6.0) / 6.0
    return x * gate[:, :, None, None]


if __name__ == "__main__":
    # Shapes consistent with SqueezeExcite(in_chs=4): reduced = _make_divisible(4*0.25, 4) = 4
    N, C, H, W = 2, 4, 16, 16
    se_ratio, divisor = 0.25, 4
    R = _make_divisible(C * se_ratio, divisor)

    key = jax.random.PRNGKey(0)
    kx, k1, k2, k3, k4 = jax.random.split(key, 5)
    x = jax.random.normal(kx, (N, C, H, W), dtype=jnp.float32)
    # Deterministic parameter init (synthetic, no checkpoint load).
    w1 = jax.random.normal(k1, (R, C), dtype=jnp.float32) * 0.1   # conv_reduce weight (1x1)
    b1 = jax.random.normal(k2, (R,), dtype=jnp.float32) * 0.1     # conv_reduce bias
    w2 = jax.random.normal(k3, (C, R), dtype=jnp.float32) * 0.1   # conv_expand weight (1x1)
    b2 = jax.random.normal(k4, (C,), dtype=jnp.float32) * 0.1     # conv_expand bias

    out = squeeze_excite(x, w1, b1, w2, b2)
    jax.block_until_ready(out)

    ref = _reference(x, w1, b1, w2, b2)
    assert jnp.allclose(out, ref, atol=1e-5, rtol=1e-5), "mismatch vs reference"
    print("KERNEL_OK")
</pallas_src>

<mosaic_0001>
module attributes {stable_mosaic.version = 11 : i64} {
  func.func @_se_kernel_chw(%arg0: i32, %arg1: memref<1x4x256xf32, #tpu.memory_space<vmem>>, %arg2: memref<4x4xf32, #tpu.memory_space<vmem>>, %arg3: memref<1x4xf32, #tpu.memory_space<vmem>>, %arg4: memref<4x4xf32, #tpu.memory_space<vmem>>, %arg5: memref<1x4xf32, #tpu.memory_space<vmem>>, %arg6: memref<1x4x256xf32, #tpu.memory_space<vmem>>) attributes {dimension_semantics = [#tpu.dimension_semantics<parallel>], iteration_bounds = array<i64: 2>, scalar_prefetch = 0 : i64, scratch_operands = 0 : i64, tpu.core_type = #tpu.core_type<tc>, window_params = [{transform_indices = @transform_0, window_bounds = array<i64: 1, 4, 256>}, {pipeline_mode = #tpu.pipeline_mode<synchronous>, transform_indices = @transform_1, window_bounds = array<i64: 4, 4>}, {pipeline_mode = #tpu.pipeline_mode<synchronous>, transform_indices = @transform_2, window_bounds = array<i64: 1, 4>}, {pipeline_mode = #tpu.pipeline_mode<synchronous>, transform_indices = @transform_3, window_bounds = array<i64: 4, 4>}, {pipeline_mode = #tpu.pipeline_mode<synchronous>, transform_indices = @transform_4, window_bounds = array<i64: 1, 4>}, {transform_indices = @transform_5, window_bounds = array<i64: 1, 4, 256>}]} {
    %c0 = arith.constant 0 : index
    %c0_0 = arith.constant 0 : index
    %c0_1 = arith.constant 0 : index
    %0 = vector.load %arg1[%c0, %c0_0, %c0_1] : memref<1x4x256xf32, #tpu.memory_space<vmem>>, vector<1x4x256xf32>
    %cst = arith.constant dense<0.000000e+00> : vector<1x4xf32>
    %1 = vector.multi_reduction <add>, %0, %cst [2] : vector<1x4x256xf32> to vector<1x4xf32>
    %cst_2 = arith.constant 3.906250e-03 : f32
    %2 = vector.broadcast %cst_2 : f32 to vector<1x4xf32>
    %3 = arith.mulf %1, %2 : vector<1x4xf32>
    %c0_3 = arith.constant 0 : index
    %c0_4 = arith.constant 0 : index
    %4 = vector.load %arg2[%c0_3, %c0_4] : memref<4x4xf32, #tpu.memory_space<vmem>>, vector<4x4xf32>
    %cst_5 = arith.constant dense<0.000000e+00> : vector<1x4xf32>
    %5 = tpu.matmul %3, %4, %cst_5 {dimension_numbers = #tpu.dot_dimension_numbers<[1], [0], [0], [1], [0, 0, 1, 1], [], []>} : vector<1x4xf32>, vector<4x4xf32>, vector<1x4xf32> -> vector<1x4xf32>
    %c0_6 = arith.constant 0 : index
    %c0_7 = arith.constant 0 : index
    %6 = vector.load %arg3[%c0_6, %c0_7] : memref<1x4xf32, #tpu.memory_space<vmem>>, vector<1x4xf32>
    %7 = arith.addf %5, %6 : vector<1x4xf32>
    %cst_8 = arith.constant 0.000000e+00 : f32
    %8 = vector.broadcast %cst_8 : f32 to vector<1x4xf32>
    %9 = arith.maximumf %7, %8 : vector<1x4xf32>
    %c0_9 = arith.constant 0 : index
    %c0_10 = arith.constant 0 : index
    %10 = vector.load %arg4[%c0_9, %c0_10] : memref<4x4xf32, #tpu.memory_space<vmem>>, vector<4x4xf32>
    %cst_11 = arith.constant dense<0.000000e+00> : vector<1x4xf32>
    %11 = tpu.matmul %9, %10, %cst_11 {dimension_numbers = #tpu.dot_dimension_numbers<[1], [0], [0], [1], [0, 0, 1, 1], [], []>} : vector<1x4xf32>, vector<4x4xf32>, vector<1x4xf32> -> vector<1x4xf32>
    %c0_12 = arith.constant 0 : index
    %c0_13 = arith.constant 0 : index
    %12 = vector.load %arg5[%c0_12, %c0_13] : memref<1x4xf32, #tpu.memory_space<vmem>>, vector<1x4xf32>
    %13 = arith.addf %11, %12 : vector<1x4xf32>
    %cst_14 = arith.constant 3.000000e+00 : f32
    %14 = vector.broadcast %cst_14 : f32 to vector<1x4xf32>
    %15 = arith.addf %13, %14 : vector<1x4xf32>
    %cst_15 = arith.constant 0.000000e+00 : f32
    %cst_16 = arith.constant 6.000000e+00 : f32
    %16 = vector.broadcast %cst_15 : f32 to vector<1x4xf32>
    %17 = arith.maximumf %16, %15 : vector<1x4xf32>
    %18 = vector.broadcast %cst_16 : f32 to vector<1x4xf32>
    %19 = arith.minimumf %18, %17 : vector<1x4xf32>
    %cst_17 = arith.constant 0.166666672 : f32
    %20 = vector.broadcast %cst_17 : f32 to vector<1x4xf32>
    %21 = arith.mulf %19, %20 : vector<1x4xf32>
    %c0_18 = arith.constant 0 : index
    %c0_19 = arith.constant 0 : index
    %c0_20 = arith.constant 0 : index
    %22 = vector.load %arg1[%c0_18, %c0_19, %c0_20] : memref<1x4x256xf32, #tpu.memory_space<vmem>>, vector<1x4x256xf32>
    %23 = vector.shape_cast %21 : vector<1x4xf32> to vector<1x4x1xf32>
    %24 = vector.broadcast %23 : vector<1x4x1xf32> to vector<1x4x256xf32>
    %25 = arith.mulf %22, %24 : vector<1x4x256xf32>
    %c0_21 = arith.constant 0 : index
    %c0_22 = arith.constant 0 : index
    %c0_23 = arith.constant 0 : index
    %26 = vector.load %arg6[%c0_21, %c0_22, %c0_23] : memref<1x4x256xf32, #tpu.memory_space<vmem>>, vector<1x4x256xf32>
    tpu.vector_store %arg6[%c0_21, %c0_22, %c0_23], %25 {strides = array<i32>} : memref<1x4x256xf32, #tpu.memory_space<vmem>>, vector<1x4x256xf32>,
    return
  }
  func.func @transform_0(%arg0: i32) -> (i32, i32, i32) {
    %c0_i32 = arith.constant 0 : i32
    %c0_i32_0 = arith.constant 0 : i32
    %c0_i32_1 = arith.constant 0 : i32
    return %arg0, %c0_i32, %c0_i32_0 : i32, i32, i32
  }
  func.func @transform_1(%arg0: i32) -> (i32, i32) {
    %c0_i32 = arith.constant 0 : i32
    %c0_i32_0 = arith.constant 0 : i32
    %c0_i32_1 = arith.constant 0 : i32
    return %c0_i32, %c0_i32_0 : i32, i32
  }
  func.func @transform_2(%arg0: i32) -> (i32, i32) {
    %c0_i32 = arith.constant 0 : i32
    %c0_i32_0 = arith.constant 0 : i32
    %c0_i32_1 = arith.constant 0 : i32
    return %c0_i32, %c0_i32_0 : i32, i32
  }
  func.func @transform_3(%arg0: i32) -> (i32, i32) {
    %c0_i32 = arith.constant 0 : i32
    %c0_i32_0 = arith.constant 0 : i32
    %c0_i32_1 = arith.constant 0 : i32
    return %c0_i32, %c0_i32_0 : i32, i32
  }
  func.func @transform_4(%arg0: i32) -> (i32, i32) {
    %c0_i32 = arith.constant 0 : i32
    %c0_i32_0 = arith.constant 0 : i32
    %c0_i32_1 = arith.constant 0 : i32
    return %c0_i32, %c0_i32_0 : i32, i32
  }
  func.func @transform_5(%arg0: i32) -> (i32, i32, i32) {
    %c0_i32 = arith.constant 0 : i32
    %c0_i32_0 = arith.constant 0 : i32
    %c0_i32_1 = arith.constant 0 : i32
    return %arg0, %c0_i32, %c0_i32_0 : i32, i32, i32
  }
}

</mosaic_0001>

<bundles_post_ra>
// kernel: tpu_custom_call.1
= control target key start
LH: loop header
LB: loop body
LE: loop exit
PB: predicated region body
PF: predicated region fallthrough
CT: control target
= control target key end

     0   :  { %10 = vsyncpa [#allocation3], 0  ;;  %s986_s0 = inlined_call_operand.hbm [shape: f32[2,4,256], index: 0, kind: input, shape index: {}]   ;;  %s987_s1 = inlined_call_operand.hbm [shape: f32[4,4], index: 1, kind: input, shape index: {}]   ;;  %s988_s2 = inlined_call_operand.vmem [shape: f32[1,4], index: 2, kind: input, shape index: {}]   ;;  %s989_s3 = inlined_call_operand.vmem [shape: f32[4,4], index: 3, kind: input, shape index: {}]   ;;  %s990_s4 = inlined_call_operand.vmem [shape: f32[1,4], index: 4, kind: input, shape index: {}]   ;;  %s991_s5 = inlined_call_operand.hbm [shape: f32[2,4,256], index: 5, kind: output, shape index: {}]  }
   0x1   :  { %12 = vsyncpa [#allocation3 + $0x1], 0 }
   0x2   :  { %13 = vsyncpa [#allocation6], 0 }
   0x3   :  { %14 = vsyncpa [#allocation4], 0 }
   0x4   :  { %16 = vsyncpa [#allocation4 + $0x1], 0  ;;  %s803_s18 = smov 0   ;;  %s805_s19 = smov 0  }
   0x5   :  { %s807_s20 = smov 0   ;;  %s809_s21 = smov 0  }
   0x6 LB: > { %s824_s22 = sadd.s32 4294967295, %s765_s21   ;;  %s546_s23 = sadd.s32 4294967294, %s765_s21   ;;  %s765_s21 = sphi %s809_s21, %s1014_s21   ;;  %s761_s20 = sphi %s807_s20, %s1013_s20   ;;  %s757_s19 = sphi %s805_s19, %s1012_s19   ;;  %s753_s18 = sphi %s803_s18, %s1011_s18  }
   0x7   : > { %p42_p0 = scmp.ne.s32.totalorder %s757_s19, %s753_s18  ;;  %p992_p1 = scmp.eq.s32.totalorder %s824_s22, 0 }
   0x8   : > { %p156_p3 = scmp.eq.s32.totalorder %s546_s23, 1  ;;  %p547_p5 = scmp.ge.s32.totalorder %s765_s21, 1 }
   0x9   : > { %p833_p4 = por %p992_p1, %p42_p0  ;;  %p163_p7 = scmp.lt.s32.totalorder %s765_s21, 3 }
   0xa   : > { %p838_p6 = por %p156_p3, %p42_p0  ;;  %s767_s27 = smov [#allocation5]  }
   0xb   : > { %s996_s24 = scalar_select %p833_p4, 1, 0 }
   0xc   : > { %s997_s25 = scalar_select %p838_p6, 1, 0 }
   0xd   : > { %p843_p8 = pnand %p547_p5, %p163_p7  ;;  %s176_s28 = sshll.u32 %s767_s27, 4  ;;  %s177_s28 = int_to_ptr.vmem [resolvable:$true] %s176_s28 }
   0xe   : > { %s851_s29 = sadd.s32 1, %s765_s21   ;;  %s29_s8 = sadd.s32 1, %s761_s20 }
   0xf   : > { %s998_s26 = scalar_select %p843_p8, 1, 0 }
  0x10   : > { %p590_p10 = pneg %p843_p8  ;;  %s26_s6 = ssub.s32 %s765_s21, %s851_s29 }
  0x11   : > { %p861_p12 = scmp.eq.s32.totalorder %s26_s6, 0  ;;  %p36_p13 = scmp.ne.s32.totalorder %s761_s20, %s757_s19 }
  0x12   : > { %p855_p11 = pnand %p590_p10, %p992_p1  ;;  %s654_s9 = scalar_lea.vmem %s177_s28, 64 }
  0x13   : > { %p655_p3 = scmp.ne.s32.totalorder %s177_s28, %s654_s9  ;;  %p662_p9 = scmp.lt.s32.totalorder %s177_s28, %s177_s28 }
  0x14   : > { %p645_p0 = pneg %p855_p11  ;;  %p663_p2 = scmp.lt.s32.totalorder %s654_s9, %s654_s9 }
  0x16   : > { %p657_p5 = pnand %p655_p3, %p645_p0  ;;  %p664_p10 = por %p663_p2, %p662_p9 }
  0x18   : > { %p658_p7 = pneg %p657_p5 }
  0x1a   : > { %p665_p1 = pnand %p664_p10, %p658_p7 }
  0x1c   : > { %668 = shalt.err (!%p665_p1)
}
  0x1d   : > { %593 = dma.hbm_to_vmem [thread:$0]  (!%p855_p11), %s987_s1, 64, %s177_s28, [#allocation6]  }
  0x1e   : > { %s878_s12 = scalar_select %p861_p12, %s761_s20, %s29_s8  }
  0x1f   : > { %p37_p1 = scmp.eq.s32.totalorder %s765_s21, 0  ;;  %p1001_p2 = scmp.eq.s32.totalorder %s824_s22, 1 }
  0x20   : > { %p603_p0 = scmp.lt.s32.totalorder %s765_s21, 2  ;;  %s196_s14 = sand.u32 1, %s761_s20  }
  0x21   : > { %p886_p9 = por %p1001_p2, %p36_p13  ;;  %p38_p3 = por %p37_p1, %p36_p13 }
  0x22   : > { %s550_s15 = sshll.u32 %s196_s14, 3  ;;  %s566_s16 = sshll.u32 %s765_s21, 7 }
  0x23   : > { %s1002_s13 = scalar_select %p886_p9, 1, 0 }
  0x24   : > { %s899_s27 = scalar_lea.hbm %s986_s0, %s566_s16  ;;  %s200_s28 = scalar_lea.vmem [#allocation2], %s550_s15 }
  0x25   : > { %s208_s30 = sshll.u32 %s200_s28, 4  ;;  %p901_p11 = pnand %p603_p0, %p38_p3  ;;  %s209_s30 = int_to_ptr.vmem [resolvable:$true] %s208_s30 }
  0x26   : > { %s197_s7 = scalar_lea.sflag [#allocation3], %s196_s14  ;;  %s669_s8 = scalar_lea.hbm %s899_s27, 128 }
  0x27   : > { %p670_p12 = scmp.ne.s32.totalorder %s899_s27, %s669_s8  ;;  %p671_p13 = pneg %p901_p11 }
  0x28   : > { %s674_s11 = scalar_lea.hbm %s986_s0, 256  ;;  %p675_p10 = scmp.lt.s32.totalorder %s899_s27, %s986_s0 }
  0x29   : > { %p672_p5 = pnand %p671_p13, %p670_p12  ;;  %p676_p1 = scmp.lt.s32.totalorder %s674_s11, %s669_s8 }
  0x2b   : > { %p673_p7 = pneg %p672_p5  ;;  %p677_p2 = por %p676_p1, %p675_p10 }
  0x2d   : > { %p678_p0 = pnand %p677_p2, %p673_p7 }
  0x2f   : > { %681 = shalt.err (!%p678_p0)
}
  0x30   : > { %s682_s17 = scalar_lea.vmem %s209_s30, 128  ;;  %s768_s14 = smov [#allocation2]  }
  0x31   : > { %p683_p3 = scmp.ne.s32.totalorder %s209_s30, %s682_s17  ;;  %s687_s23 = sshll.u32 %s768_s14, 4  ;;  %s688_s23 = int_to_ptr.vmem [resolvable:$false] %s687_s23 }
  0x32   : > { %s689_s28 = scalar_lea.vmem %s688_s23, 256  ;;  %p690_p12 = scmp.lt.s32.totalorder %s209_s30, %s688_s23 }
  0x33   : > { %p685_p6 = pnand %p683_p3, %p671_p13  ;;  %p691_p5 = scmp.lt.s32.totalorder %s689_s28, %s682_s17 }
  0x35   : > { %p686_p9 = pneg %p685_p6  ;;  %p692_p4 = por %p691_p5, %p690_p12 }
  0x37   : > { %p693_p8 = pnand %p692_p4, %p686_p9 }
  0x39   : > { %696 = shalt.err (!%p693_p8)
}
  0x3a   : > { %597 = dma.hbm_to_vmem [thread:$0]  (!%p901_p11), %s899_s27, 128, %s209_s30, %s197_s7  }
  0x3b   : > { %p1004_p7 = scmp.ne.s32.totalorder %s998_s26, 0 }
  0x3c   : > { %s922_s8 = sand.u32 (!%p1004_p7), 1, %s757_s19   ;;  %p1005_p4 = scmp.ne.s32.totalorder (!%p1004_p7), %s996_s24, 0 }
  0x3d   : > { %217 = sbr.rel (%p1004_p7) target bundleno = 752 (0x2f0), region = 40  ;;  %s554_s9 = sshll.u32 (!%p1004_p7), %s922_s8, 3 }
  0x3e   : > { %s220_s10 = scalar_lea.sflag (!%p1004_p7), [#allocation3], %s922_s8  ;;  %s223_s11 = scalar_lea.vmem (!%p1004_p7), [#allocation2], %s554_s9 }
  0x42   : > { %740 = dma.done.wait (%p1005_p4), %s220_s10, 128  }
  0x43   : > { %742 = vsyncadd (%p1005_p4), %s220_s10, 4294967168  ;;  %p1006_p6 = scmp.eq.s32.totalorder %s824_s22, 0 }
  0x45   : > { %744 = dma.done.wait (%p1006_p6), [#allocation6], 64   ;;  %p1007_p8 = pmov %p1006_p6 }
  0x46   : > { %vm258_vm0 = vcmask 1043456   ;;  %v254_v0 = vld [vmem:[%s223_s11] sm:$0xff]  ;;  %v769_v5 = vmov 0.0   ;;  %v265_v6 = vld [vmem:[#allocation5] sm:$0xf]  ;;  %vm770_vm1 = vmmov 0   ;;  %v268_v7 = vlaneseq }
  0x47   : > { %746 = vsyncadd (%p1007_p8), [#allocation6], 4294967232  ;;  %v256_v1 = vcombine.high %v254_v0, %v254_v0  ;;  %v259_v2 = vsel %vm258_vm0, %v254_v0, 0.0  ;;  %572 = vmatprep.subr.mxu0 %v769_v5  ;;  %577 = vmatprep.subr.mxu1 %v769_v5  ;;  %vm274_vm2 = vcmask 31744   ;;  %v351_v14 = vld [vmem:[%s989_s3] sm:$0xf] }
  0x48   : > { %573 = vmatpush3.msk.msra.mxu0 %vm258_vm0, %v265_v6  ;;  %574 = vmatprep.mubr.msk.f32.mxu0 %vm770_vm1, %v769_v5  ;;  %v269_v8 = vand.u32 127, %v268_v7  ;;  %v271_v9 = vshrl.u32 %v268_v7, 7  ;;  %v266_v15 = vld [vmem:[%s988_s2] sm:$0x1]  ;;  %v771_v30 = vmov 839922192  }
  0x49   : > { %v260_v3 = vsel %vm258_vm0, %v256_v1, 0.0  ;;  %579 = vmatprep.mubr.msk.f32.mxu1 %vm770_vm1, %v769_v5  ;;  %578 = vmatpush3.msk.msra.mxu1 %vm258_vm0, %v351_v14  ;;  %v352_v20 = vld [vmem:[%s990_s4] sm:$0x1]  ;;  %v442_v31 = vunpack.c.l.s4 %v771_v30  ;;  %s567_s16 = sshll.u32 %s824_s22, 7  ;;  %s253_s15 = scalar_lea.vmem [#allocation7], %s554_s9 }
  0x4a   : > { %v261_v4 = vadd.f32 %v260_v3, %v259_v2  ;;  %v272_v10 = vsub.s32 %v269_v8, %v271_v9  ;;  %v435_v27 = vsub.s32 0, %v271_v9  ;;  %s466_s17 = sshll.u32 %s253_s15, 4  ;;  %s464_s28 = scalar_lea.hbm %s991_s5, %s567_s16  ;;  %s467_s17 = int_to_ptr.vmem [resolvable:$true] %s466_s17 }
  0x4b   : > { %v443_v32 = vunpack.c.0.s8 %v442_v31  ;;  %s452_s10 = scalar_lea.sflag [#allocation4], %s922_s8  ;;  %s697_s11 = scalar_lea.vmem %s467_s17, 128 }
  0x4c   : > { %262 = vadd.xlane.f32.xlu0 %v261_v4  ;;  %p698_p9 = scmp.ne.s32.totalorder %s467_s17, %s697_s11  ;;  %p1008_p11 = scmp.ne.s32.totalorder %s1002_s13, 0 }
  0x4d   : > { %v446_v33 = vsub.s32 %v443_v32, %v271_v9  ;;  %s772_s24 = smov [#allocation7]  }
  0x4e   : > { %p699_p13 = pnand %p698_p9, %p1008_p11  ;;  %s701_s26 = sshll.u32 %s772_s24, 4  ;;  %s702_s26 = int_to_ptr.vmem [resolvable:$false] %s701_s26 }
  0x4f   : > { %s703_s22 = scalar_lea.vmem %s702_s26, 256  ;;  %p704_p1 = scmp.lt.s32.totalorder %s467_s17, %s702_s26 }
  0x50   : > { %p700_p10 = pneg %p699_p13  ;;  %p705_p2 = scmp.lt.s32.totalorder %s703_s22, %s697_s11 }
  0x52   : > { %p706_p0 = por %p705_p2, %p704_p1 }
  0x54   : > { %p707_p3 = pnand %p706_p0, %p700_p10 }
  0xd5   : > { %v263_v11 = vpop.xlane.xlu0 %262 }
  0xd6   : > { %v264_v12 = vmul.f32 0.00390625, %v263_v11 }
  0xd8   : > { %v273_v13 = vrot.slane %v264_v12, %v272_v10 }
  0xda   : > { %575 = vmatmul.mubr.msk.f32.vlgmr.msra.gmra.mxu0 %vm274_vm2, %v273_v13 }
 0x19a   : > { %v346_v16 = vpop.f32.mrf.mxu0 }
 0x19b   : > { %v347_v17 = vadd.f32 %v346_v16, %v266_v15 }
 0x19c   : > { %v576_v18 = vpop.f32.mrf.mxu0 }
 0x19d   : > { %v350_v19 = vmax.f32 %v347_v17, 0.0 }
 0x19f   : > { %580 = vmatmul.mubr.msk.f32.vlgmr.msra.gmra.mxu1 %vm274_vm2, %v350_v19 }
 0x25f   : > { %v425_v21 = vpop.f32.mrf.mxu1 }
 0x260   : > { %v426_v22 = vadd.f32 %v425_v21, %v352_v20 }
 0x261   : > { %v581_v23 = vpop.f32.mrf.mxu1 }
 0x262   : > { %v429_v24 = vadd.f32 3.0, %v426_v22 }
 0x264   : > { %v430_v25 = vmax.f32 %v429_v24, 0.0 }
 0x266   : > { %v431_v26 = vmin.f32 %v430_v25, 6.0 }
 0x268   : > { %v432_v28 = vmul.f32 0.16666667, %v431_v26 }
 0x26a   : > { %v436_v29 = vrot.slane %v432_v28, %v435_v27 }
 0x26c   : > { %438 = vbcast.lane.b32.xlu0 %v436_v29, 256 }
 0x2de   : > { %v439_v34 = vpop.permute.xlu0 %438 }
 0x2df   : > { %v447_v35 = vrot.slane %v439_v34, %v446_v33 }
 0x2e1   : > { %v449_v36 = vmul.f32 %v447_v35, %v254_v0 }
 0x2e3   : > { %450 = vst [vmem:[%s253_s15] sm:$0xff] %v449_v36 }
 0x2e4   : > { %710 = shalt.err (!%p707_p3)
}
 0x2e5   : > { %s711_s9 = scalar_lea.hbm %s464_s28, 128  ;;  %s715_s30 = scalar_lea.hbm %s991_s5, 256 }
 0x2e6   : > { %p712_p12 = scmp.ne.s32.totalorder %s464_s28, %s711_s9  ;;  %p716_p4 = scmp.lt.s32.totalorder %s464_s28, %s991_s5 }
 0x2e7   : > { %p717_p6 = scmp.lt.s32.totalorder %s715_s30, %s711_s9 }
 0x2e8   : > { %p713_p5 = pnand %p712_p12, %p1008_p11 }
 0x2e9   : > { %p718_p8 = por %p717_p6, %p716_p4 }
 0x2ea   : > { %p714_p7 = pneg %p713_p5 }
 0x2ec   : > { %p719_p9 = pnand %p718_p8, %p714_p7 }
 0x2ee   : > { %722 = shalt.err (!%p719_p9)
}
 0x2ef   : > { %588 = dma.vmem_to_hbm [thread:$0]  (%p1008_p11), %s467_s17, 128, %s464_s28, %s452_s10  }
 0x2f0 PF: > { %s478_s16 = sand.u32 1, %s753_s18   ;;  %p1009_p13 = scmp.ne.s32.totalorder %s997_s25, 0 }
 0x2f1   : > { %p1010_p10 = scmp.ge.s32.totalorder %s765_s21, 2  ;;  %s479_s15 = scalar_lea.sflag [#allocation4], %s478_s16 }
 0x2f3   : > { %p599_p1 = pnand %p1010_p10, %p1009_p13 }
 0x2f5   : > { %p600_p2 = pneg %p599_p1 }
 0x2f7   : > { %748 = dma.done.wait (%p600_p2), %s479_s15, 128  }
 0x2f8   : > { %750 = vsyncadd (%p600_p2), %s479_s15, 4294967168  ;;  %p19_p0 = scmp.ge.s32.totalorder %s851_s29, 4   ;;  %s1011_s18 = smov %s757_s19 }
 0x2f9   : > { %s1012_s19 = smov %s761_s20  ;;  %s1013_s20 = smov %s878_s12 }
 0x2fa   : > { %s1014_s21 = smov %s851_s29  ;;  %21 = sbr.rel (!%p19_p0) target bundleno = 6 (0x6), region = 89 }
 0x2ff   :  { %484 = vsyncpa [#allocation3], 1 }
 0x300   :  { %486 = vsyncpa [#allocation3 + $0x1], 1 }
 0x301   :  { %487 = vsyncpa [#allocation6], 1 }
 0x302   :  { %488 = vsyncpa [#allocation4], 1 }
 0x303   :  { %490 = vsyncpa [#allocation4 + $0x1], 1 }

</bundles_post_ra>
